<compile_context>
chip_gen: v6e
topology: v6e:2x2x1
jax: 0.10.0
libtpu: 0.0.40
codegen_flags: <defaults>
</compile_context>

<pallas_src>
import jax
import jax.numpy as jnp
from jax.experimental import pallas as pl
from jax.experimental.pallas import tpu as pltpu


def _outconv_kernel(x_ref, w_ref, b_ref, o_ref):
    # x_ref: (N*C_in, HW) VMEM — one exact (8,128)-aligned, lane-dense tile.
    # w_ref: (C_out, C_in) VMEM, b_ref: (C_out, 1) VMEM.
    # o_ref: (N, C_out, HW) VMEM — lane-dense spatial axis.
    n_batch, c_out, hw = o_ref.shape
    c_in = w_ref.shape[1]

    x = x_ref[...]          # single full-tile load of all N*C_in rows
    w = w_ref[...]          # (C_out, C_in)
    b = b_ref[...]          # (C_out, 1) — lane-broadcasts in the add below

    # Static unroll over the (tiny) batch: N=2 iterations, no grid steps.
    for n in range(n_batch):
        base = n * c_in
        # Full-width (C_out, HW) tile FMAs:
        #   (1, HW) input row  (sublane-broadcast)  x  (C_out, 1) weight column
        #   (lane-broadcast)  ->  (C_out, HW), accumulated on the VPU.
        acc = x[base:base + 1, :] * w[:, 0:1] + b
        for ci in range(1, c_in):
            acc = acc + x[base + ci:base + ci + 1, :] * w[:, ci:ci + 1]
        # Direct whole-tile store for this batch element — no concatenate,
        # no sublane relayout (each n writes sublane offset 0 of its tile).
        o_ref[n, :, :] = acc.astype(o_ref.dtype)


def outconv_pallas(x_nchw, weight, bias):
    """Forward of nn.Conv2d(in_ch, out_ch, kernel_size=1).

    x_nchw: (N, C_in, H, W) float32
    weight: (C_out, C_in, 1, 1) float32
    bias:   (C_out,) float32
    returns (N, C_out, H, W) float32
    """
    N, C_in, H, W = x_nchw.shape
    C_out = weight.shape[0]
    HW = H * W

    # Free reshapes only — NCHW is already the right memory order.
    x2 = x_nchw.reshape(N * C_in, HW)   # (8, 256): exact full-sublane tile
    w2 = weight.reshape(C_out, C_in)    # (3, 4)
    b2 = bias.reshape(C_out, 1)         # (3, 1)

    out3 = pl.pallas_call(
        _outconv_kernel,
        out_shape=jax.ShapeDtypeStruct((N, C_out, HW), x_nchw.dtype),
        # No grid: one kernel invocation, whole arrays resident in VMEM.
        in_specs=[
            pl.BlockSpec(memory_space=pltpu.MemorySpace.VMEM),
            pl.BlockSpec(memory_space=pltpu.MemorySpace.VMEM),
            pl.BlockSpec(memory_space=pltpu.MemorySpace.VMEM),
        ],
        out_specs=pl.BlockSpec(memory_space=pltpu.MemorySpace.VMEM),
    )(x2, w2, b2)

    return out3.reshape(N, C_out, H, W)


if __name__ == "__main__":
    # Module config: outconv(in_ch=4, out_ch=3); input (2, 4, 16, 16)
    N, C_in, C_out, H, W = 2, 4, 3, 16, 16

    key = jax.random.PRNGKey(0)
    kx, kw, kb = jax.random.split(key, 3)
    x = jax.random.normal(kx, (N, C_in, H, W), dtype=jnp.float32)
    # Deterministic synthetic params matching nn.Conv2d(in_ch, out_ch, 1) shapes.
    weight = jax.random.normal(kw, (C_out, C_in, 1, 1), dtype=jnp.float32) * 0.1
    bias = jax.random.normal(kb, (C_out,), dtype=jnp.float32) * 0.1

    out = outconv_pallas(x, weight, bias)
    out = jax.block_until_ready(out)

    # Reference check (pure JAX 1x1 conv) to validate semantics.
    ref = jnp.einsum("nchw,oc->nohw", x, weight.reshape(C_out, C_in)) \
          + bias.reshape(1, C_out, 1, 1)
    assert out.shape == (N, C_out, H, W)
    assert jnp.allclose(out, ref, atol=1e-5, rtol=1e-5)

    print("KERNEL_OK")
</pallas_src>

<mosaic_0001>
module attributes {stable_mosaic.version = 11 : i64} {
  func.func @_outconv_kernel(%arg0: memref<8x256xf32, #tpu.memory_space<vmem>>, %arg1: memref<3x4xf32, #tpu.memory_space<vmem>>, %arg2: memref<3x1xf32, #tpu.memory_space<vmem>>, %arg3: memref<2x3x256xf32, #tpu.memory_space<vmem>>) attributes {dimension_semantics = [], scalar_prefetch = 0 : i64, scratch_operands = 0 : i64, tpu.core_type = #tpu.core_type<tc>} {
    %c0 = arith.constant 0 : index
    %c0_0 = arith.constant 0 : index
    %0 = vector.load %arg0[%c0, %c0_0] : memref<8x256xf32, #tpu.memory_space<vmem>>, vector<8x256xf32>
    %c0_1 = arith.constant 0 : index
    %c0_2 = arith.constant 0 : index
    %1 = vector.load %arg1[%c0_1, %c0_2] : memref<3x4xf32, #tpu.memory_space<vmem>>, vector<3x4xf32>
    %c0_3 = arith.constant 0 : index
    %c0_4 = arith.constant 0 : index
    %2 = vector.load %arg2[%c0_3, %c0_4] : memref<3x1xf32, #tpu.memory_space<vmem>>, vector<3x1xf32>
    %3 = vector.extract_strided_slice %0 {offsets = [0, 0], sizes = [1, 256], strides = [1, 1]} : vector<8x256xf32> to vector<1x256xf32>
    %4 = vector.extract_strided_slice %1 {offsets = [0, 0], sizes = [3, 1], strides = [1, 1]} : vector<3x4xf32> to vector<3x1xf32>
    %5 = vector.broadcast %3 : vector<1x256xf32> to vector<3x256xf32>
    %6 = vector.broadcast %4 : vector<3x1xf32> to vector<3x256xf32>
    %7 = arith.mulf %5, %6 : vector<3x256xf32>
    %8 = vector.broadcast %2 : vector<3x1xf32> to vector<3x256xf32>
    %9 = arith.addf %7, %8 : vector<3x256xf32>
    %10 = vector.extract_strided_slice %0 {offsets = [1, 0], sizes = [1, 256], strides = [1, 1]} : vector<8x256xf32> to vector<1x256xf32>
    %11 = vector.extract_strided_slice %1 {offsets = [0, 1], sizes = [3, 1], strides = [1, 1]} : vector<3x4xf32> to vector<3x1xf32>
    %12 = vector.broadcast %10 : vector<1x256xf32> to vector<3x256xf32>
    %13 = vector.broadcast %11 : vector<3x1xf32> to vector<3x256xf32>
    %14 = arith.mulf %12, %13 : vector<3x256xf32>
    %15 = arith.addf %9, %14 : vector<3x256xf32>
    %16 = vector.extract_strided_slice %0 {offsets = [2, 0], sizes = [1, 256], strides = [1, 1]} : vector<8x256xf32> to vector<1x256xf32>
    %17 = vector.extract_strided_slice %1 {offsets = [0, 2], sizes = [3, 1], strides = [1, 1]} : vector<3x4xf32> to vector<3x1xf32>
    %18 = vector.broadcast %16 : vector<1x256xf32> to vector<3x256xf32>
    %19 = vector.broadcast %17 : vector<3x1xf32> to vector<3x256xf32>
    %20 = arith.mulf %18, %19 : vector<3x256xf32>
    %21 = arith.addf %15, %20 : vector<3x256xf32>
    %22 = vector.extract_strided_slice %0 {offsets = [3, 0], sizes = [1, 256], strides = [1, 1]} : vector<8x256xf32> to vector<1x256xf32>
    %23 = vector.extract_strided_slice %1 {offsets = [0, 3], sizes = [3, 1], strides = [1, 1]} : vector<3x4xf32> to vector<3x1xf32>
    %24 = vector.broadcast %22 : vector<1x256xf32> to vector<3x256xf32>
    %25 = vector.broadcast %23 : vector<3x1xf32> to vector<3x256xf32>
    %26 = arith.mulf %24, %25 : vector<3x256xf32>
    %27 = arith.addf %21, %26 : vector<3x256xf32>
    %c0_5 = arith.constant 0 : index
    %c0_6 = arith.constant 0 : index
    %c0_7 = arith.constant 0 : index
    %28 = vector.load %arg3[%c0_5, %c0_6, %c0_7] : memref<2x3x256xf32, #tpu.memory_space<vmem>>, vector<1x3x256xf32>
    %29 = vector.shape_cast %28 : vector<1x3x256xf32> to vector<3x256xf32>
    %30 = vector.shape_cast %27 : vector<3x256xf32> to vector<1x3x256xf32>
    tpu.vector_store %arg3[%c0_5, %c0_6, %c0_7], %30 {strides = array<i32>} : memref<2x3x256xf32, #tpu.memory_space<vmem>>, vector<1x3x256xf32>,
    %31 = vector.extract_strided_slice %0 {offsets = [4, 0], sizes = [1, 256], strides = [1, 1]} : vector<8x256xf32> to vector<1x256xf32>
    %32 = vector.extract_strided_slice %1 {offsets = [0, 0], sizes = [3, 1], strides = [1, 1]} : vector<3x4xf32> to vector<3x1xf32>
    %33 = vector.broadcast %31 : vector<1x256xf32> to vector<3x256xf32>
    %34 = vector.broadcast %32 : vector<3x1xf32> to vector<3x256xf32>
    %35 = arith.mulf %33, %34 : vector<3x256xf32>
    %36 = vector.broadcast %2 : vector<3x1xf32> to vector<3x256xf32>
    %37 = arith.addf %35, %36 : vector<3x256xf32>
    %38 = vector.extract_strided_slice %0 {offsets = [5, 0], sizes = [1, 256], strides = [1, 1]} : vector<8x256xf32> to vector<1x256xf32>
    %39 = vector.extract_strided_slice %1 {offsets = [0, 1], sizes = [3, 1], strides = [1, 1]} : vector<3x4xf32> to vector<3x1xf32>
    %40 = vector.broadcast %38 : vector<1x256xf32> to vector<3x256xf32>
    %41 = vector.broadcast %39 : vector<3x1xf32> to vector<3x256xf32>
    %42 = arith.mulf %40, %41 : vector<3x256xf32>
    %43 = arith.addf %37, %42 : vector<3x256xf32>
    %44 = vector.extract_strided_slice %0 {offsets = [6, 0], sizes = [1, 256], strides = [1, 1]} : vector<8x256xf32> to vector<1x256xf32>
    %45 = vector.extract_strided_slice %1 {offsets = [0, 2], sizes = [3, 1], strides = [1, 1]} : vector<3x4xf32> to vector<3x1xf32>
    %46 = vector.broadcast %44 : vector<1x256xf32> to vector<3x256xf32>
    %47 = vector.broadcast %45 : vector<3x1xf32> to vector<3x256xf32>
    %48 = arith.mulf %46, %47 : vector<3x256xf32>
    %49 = arith.addf %43, %48 : vector<3x256xf32>
    %50 = vector.extract_strided_slice %0 {offsets = [7, 0], sizes = [1, 256], strides = [1, 1]} : vector<8x256xf32> to vector<1x256xf32>
    %51 = vector.extract_strided_slice %1 {offsets = [0, 3], sizes = [3, 1], strides = [1, 1]} : vector<3x4xf32> to vector<3x1xf32>
    %52 = vector.broadcast %50 : vector<1x256xf32> to vector<3x256xf32>
    %53 = vector.broadcast %51 : vector<3x1xf32> to vector<3x256xf32>
    %54 = arith.mulf %52, %53 : vector<3x256xf32>
    %55 = arith.addf %49, %54 : vector<3x256xf32>
    %c1 = arith.constant 1 : index
    %c0_8 = arith.constant 0 : index
    %c0_9 = arith.constant 0 : index
    %56 = vector.load %arg3[%c1, %c0_8, %c0_9] : memref<2x3x256xf32, #tpu.memory_space<vmem>>, vector<1x3x256xf32>
    %57 = vector.shape_cast %56 : vector<1x3x256xf32> to vector<3x256xf32>
    %58 = vector.shape_cast %55 : vector<3x256xf32> to vector<1x3x256xf32>
    tpu.vector_store %arg3[%c1, %c0_8, %c0_9], %58 {strides = array<i32>} : memref<2x3x256xf32, #tpu.memory_space<vmem>>, vector<1x3x256xf32>,
    return
  }
}

</mosaic_0001>

<bundles_post_ra>
// kernel: tpu_custom_call.1
= control target key start
LH: loop header
LB: loop body
LE: loop exit
PB: predicated region body
PF: predicated region fallthrough
CT: control target
= control target key end

     0   :  { %8 = vsyncpa [#allocation3], 0  ;;  %s196_s12 = smov [#allocation2]   ;;  %s236_s0 = inlined_call_operand.hbm [shape: f32[8,256], index: 0, kind: input, shape index: {}]   ;;  %s237_s1 = inlined_call_operand.vmem [shape: f32[3,4], index: 1, kind: input, shape index: {}]   ;;  %s238_s2 = inlined_call_operand.vmem [shape: f32[3,1], index: 2, kind: input, shape index: {}]   ;;  %s239_s3 = inlined_call_operand.vmem [shape: f32[2,3,256], index: 3, kind: output, shape index: {}]  }
   0x1   :  { %s15_s13 = sshll.u32 %s196_s12, 4  ;;  %s16_s13 = int_to_ptr.vmem [resolvable:$true] %s15_s13 }
   0x2   :  { %s182_s14 = scalar_lea.vmem %s16_s13, 256  ;;  %p187_p1 = scmp.lt.s32.totalorder %s16_s13, %s16_s13 }
   0x3   :  { %p183_p0 = scmp.ne.s32.totalorder %s16_s13, %s182_s14  ;;  %p188_p2 = scmp.lt.s32.totalorder %s182_s14, %s182_s14 }
   0x5   :  { %p189_p3 = por %p188_p2, %p187_p1 }
   0x7   :  { %p190_p4 = pnand %p189_p3, %p183_p0 }
   0x9   :  { %193 = shalt.err (!%p190_p4)
}
   0xa   :  { %18 = dma.hbm_to_vmem [thread:$0]  %s236_s0, 256, %s16_s13, [#allocation3]  }
   0xb   :  { %194 = dma.done.wait [#allocation3], 256  }
   0xc   :  { %195 = vsyncadd [#allocation3], 4294967040  ;;  %v197_v0 = vmov 0   ;;  %v198_v1 = vmov 1   ;;  %v28_v2 = vld [vmem:[%s237_s1] sm:$0x7]  ;;  %v30_v6 = vlaneseq }
   0xd   :  { %170 = vset.pattern.permute.xlu0 %v197_v0  ;;  %171 = vset.pattern.permute.xlu1 %v198_v1  ;;  %v29_v3 = vld [vmem:[%s238_s2] sm:$0x7]  ;;  %v199_v4 = vmov 2   ;;  %v200_v5 = vmov 3   ;;  %v27_v11 = vld [vmem:[#allocation2 + $0x8] sm:$0xff] }
   0xe   :  { %40 = vperm.xlu0 %170, %v28_v2   ;;  %61 = vperm.xlu1 %171, %v28_v2   ;;  %v31_v7 = vshrl.u32 %v30_v6, 7  ;;  %v26_v10 = vld [vmem:[#allocation2] sm:$0xff] }
  0x10   :  { %v32_v8 = vsub.s32 0, %v31_v7  ;;  %v107_v9 = vsub.s32 4, %v31_v7  ;;  %v54_v12 = vsub.s32 1, %v31_v7  ;;  %v119_v13 = vsub.s32 5, %v31_v7 }
  0x11   :  { %v70_v14 = vsub.s32 2, %v31_v7  ;;  %v131_v15 = vsub.s32 6, %v31_v7  ;;  %v86_v16 = vsub.s32 3, %v31_v7  ;;  %v143_v17 = vsub.s32 7, %v31_v7 }
  0x12   :  { %47 = vperm.xlu0 %170, %v29_v3   ;;  %172 = vset.pattern.permute.xlu1 %v199_v4  ;;  %v33_v18 = vrot.slane %v26_v10, %v32_v8  ;;  %v37_v19 = vrot.slane %v27_v11, %v32_v8  ;;  %v108_v20 = vrot.slane %v26_v10, %v107_v9 }
  0x13   :  { %77 = vperm.xlu1 %172, %v28_v2   ;;  %v112_v21 = vrot.slane %v27_v11, %v107_v9  ;;  %v55_v24 = vrot.slane %v26_v10, %v54_v12  ;;  %v59_v25 = vrot.slane %v27_v11, %v54_v12  ;;  %v120_v26 = vrot.slane %v26_v10, %v119_v13 }
  0x14   :  { %v124_v27 = vrot.slane %v27_v11, %v119_v13  ;;  %v71_v28 = vrot.slane %v26_v10, %v70_v14  ;;  %v75_v29 = vrot.slane %v27_v11, %v70_v14  ;;  %v132_v30 = vrot.slane %v26_v10, %v131_v15 }
  0x15   :  { %v136_v31 = vrot.slane %v27_v11, %v131_v15  ;;  %v87_v32 = vrot.slane %v26_v10, %v86_v16  ;;  %v91_v33 = vrot.slane %v27_v11, %v86_v16  ;;  %v144_v34 = vrot.slane %v26_v10, %v143_v17 }
  0x16   :  { %173 = vset.pattern.permute.xlu0 %v200_v5  ;;  %v148_v35 = vrot.slane %v27_v11, %v143_v17 }
  0x17   :  { %93 = vperm.xlu0 %173, %v28_v2  }
  0x89   :  { %v41_v22 = vpop.permute.xlu0 %40  ;;  %v62_v23 = vpop.permute.xlu1 %61 }
  0x8a   :  { %v43_v36 = vmul.f32 %v41_v22, %v33_v18  ;;  %v44_v37 = vmul.f32 %v41_v22, %v37_v19  ;;  %v113_v38 = vmul.f32 %v108_v20, %v41_v22  ;;  %v114_v39 = vmul.f32 %v112_v21, %v41_v22 }
  0x8b   :  { %v64_v40 = vmul.f32 %v62_v23, %v55_v24  ;;  %v65_v41 = vmul.f32 %v62_v23, %v59_v25  ;;  %v125_v42 = vmul.f32 %v120_v26, %v62_v23  ;;  %v126_v43 = vmul.f32 %v124_v27, %v62_v23 }
  0x8d   :  { %v48_v44 = vpop.permute.xlu0 %47 }
  0x8e   :  { %v50_v45 = vadd.f32 %v48_v44, %v43_v36  ;;  %v51_v46 = vadd.f32 %v48_v44, %v44_v37  ;;  %v115_v47 = vadd.f32 %v113_v38, %v48_v44  ;;  %v116_v48 = vadd.f32 %v114_v39, %v48_v44  ;;  %v78_v49 = vpop.permute.xlu1 %77 }
  0x8f   :  { %v80_v50 = vmul.f32 %v78_v49, %v71_v28  ;;  %v81_v51 = vmul.f32 %v78_v49, %v75_v29  ;;  %v137_v52 = vmul.f32 %v132_v30, %v78_v49  ;;  %v138_v53 = vmul.f32 %v136_v31, %v78_v49 }
  0x90   :  { %v66_v54 = vadd.f32 %v64_v40, %v50_v45  ;;  %v67_v55 = vadd.f32 %v65_v41, %v51_v46  ;;  %v127_v56 = vadd.f32 %v125_v42, %v115_v47  ;;  %v128_v57 = vadd.f32 %v126_v43, %v116_v48 }
  0x92   :  { %v82_v58 = vadd.f32 %v80_v50, %v66_v54  ;;  %v83_v59 = vadd.f32 %v81_v51, %v67_v55  ;;  %v139_v60 = vadd.f32 %v137_v52, %v127_v56  ;;  %v140_v61 = vadd.f32 %v138_v53, %v128_v57  ;;  %v94_v62 = vpop.permute.xlu0 %93 }
  0x93   :  { %v96_v63 = vmul.f32 %v94_v62, %v87_v32  ;;  %v97_v0 = vmul.f32 %v94_v62, %v91_v33  ;;  %v149_v1 = vmul.f32 %v144_v34, %v94_v62  ;;  %v150_v2 = vmul.f32 %v148_v35, %v94_v62 }
  0x95   :  { %v98_v3 = vadd.f32 %v96_v63, %v82_v58  ;;  %v99_v4 = vadd.f32 %v97_v0, %v83_v59  ;;  %v151_v5 = vadd.f32 %v149_v1, %v139_v60  ;;  %v152_v6 = vadd.f32 %v150_v2, %v140_v61 }
  0x97   :  { %v102_v7 = vcombine.low %v98_v3, %v99_v4  ;;  %v155_v8 = vcombine.low %v151_v5, %v152_v6 }
  0x99   :  { %104 = vst [vmem:[%s239_s3] sm:$0x77] %v102_v7  ;;  %164 = vst [vmem:[%s239_s3 + $0x8] sm:$0x77] %v155_v8 }
  0x9a   :  { %163 = vsyncpa [#allocation3], 1 }

</bundles_post_ra>
